<compile_context>
chip_gen: v6e
topology: v6e:2x2x1
jax: 0.10.0
libtpu: 0.0.40
codegen_flags: <defaults>
</compile_context>

<pallas_src>
import functools

import jax
import jax.numpy as jnp
from jax.experimental import pallas as pl
from jax.experimental.pallas import tpu as pltpu

_VMEM_LIMIT = 32 * 1024 * 1024
_LANE = 128


def _round_up(x, m):
    return (x + m - 1) // m * m


# ---------------------------------------------------------------------------
# Kernel 1: fused direct conv, 3x3 / stride 1 / pad 1  (+bias +residual +ReLU)
# ---------------------------------------------------------------------------
def _conv3x3_taps(x_ref, w_ref, *, cin, oh, ow, tn):
    """Accumulate the 9 shifted-window matmuls of a 3x3/s1 conv in f32."""
    acc = jnp.zeros((oh * ow, tn), jnp.float32)
    for t in range(9):
        i, j = divmod(t, 3)
        # Window read directly from the VMEM-resident padded activation;
        # lane-slice to the real cin (drops the 64->128 zero-K MXU work).
        xt = x_ref[0, pl.ds(i, oh), pl.ds(j, ow), pl.ds(0, cin)]
        xt = xt.reshape(oh * ow, cin)
        wt = w_ref[pl.ds(t * cin, cin), :]
        acc = acc + jnp.dot(xt, wt, preferred_element_type=jnp.float32)
    return acc


def _conv3x3_s1_kernel(x_ref, w_ref, b_ref, o_ref, *, cin, relu):
    _, oh, ow, tn = o_ref.shape
    acc = _conv3x3_taps(x_ref, w_ref, cin=cin, oh=oh, ow=ow, tn=tn)
    out = acc + b_ref[...]
    if relu:
        out = jnp.maximum(out, 0.0)
    o_ref[0] = out.reshape(oh, ow, tn).astype(o_ref.dtype)


def _conv3x3_s1_res_kernel(x_ref, w_ref, b_ref, r_ref, o_ref, *, cin):
    _, oh, ow, tn = o_ref.shape
    acc = _conv3x3_taps(x_ref, w_ref, cin=cin, oh=oh, ow=ow, tn=tn)
    res = r_ref[0].reshape(oh * ow, tn).astype(jnp.float32)
    out = jnp.maximum(acc + b_ref[...] + res, 0.0)
    o_ref[0] = out.reshape(oh, ow, tn).astype(o_ref.dtype)


def conv3x3_s1(x, p, relu=True, residual=None):
    """Fused 3x3 / stride-1 / pad-1 conv + folded BN (+residual) (+ReLU).

    x: [N, H, W, Cact] bf16 with Cact >= p['cin'] (extra channels are zeros).
    The activation window is read inside the kernel; no im2col in HBM.
    TODO(synk): add output-row tiling for very large spatial activations.
    """
    n, h, w, cact = x.shape
    cin = p["cin"]
    cout = p["w2d"].shape[1]
    oh, ow = h, w
    xp = jnp.pad(x, ((0, 0), (1, 1), (1, 1), (0, 0)))
    tn = cout if cout <= 256 else 256

    args = [xp, p["w2d"], p["b2d"]]
    in_specs = [
        pl.BlockSpec((1, h + 2, w + 2, cact), lambda ni, jc: (ni, 0, 0, 0)),
        pl.BlockSpec((9 * cin, tn), lambda ni, jc: (0, jc)),
        pl.BlockSpec((1, tn), lambda ni, jc: (0, jc)),
    ]
    if residual is None:
        kernel = functools.partial(_conv3x3_s1_kernel, cin=cin, relu=relu)
    else:
        args.append(residual)
        in_specs.append(
            pl.BlockSpec((1, oh, ow, tn), lambda ni, jc: (ni, 0, 0, jc)))
        kernel = functools.partial(_conv3x3_s1_res_kernel, cin=cin)

    bytes_accessed = 2 * (xp.size + p["w2d"].size + n * oh * ow * cout) + 4 * cout
    if residual is not None:
        bytes_accessed += 2 * n * oh * ow * cout
    cost = pl.CostEstimate(flops=2 * n * oh * ow * 9 * cin * cout,
                           transcendentals=0, bytes_accessed=bytes_accessed)

    return pl.pallas_call(
        kernel,
        out_shape=jax.ShapeDtypeStruct((n, oh, ow, cout), jnp.bfloat16),
        grid_spec=pltpu.PrefetchScalarGridSpec(
            num_scalar_prefetch=0,
            grid=(n, cout // tn),
            in_specs=in_specs,
            out_specs=pl.BlockSpec((1, oh, ow, tn),
                                   lambda ni, jc: (ni, 0, 0, jc))),
        compiler_params=pltpu.CompilerParams(
            dimension_semantics=("parallel", "parallel"),
            vmem_limit_bytes=_VMEM_LIMIT),
        cost_estimate=cost,
    )(*args)


# ---------------------------------------------------------------------------
# Kernel 2: single-K-step GEMM (+bias +ReLU) for conv1 / stride-2 convs
# ---------------------------------------------------------------------------
def _gemm_bias_act_kernel(x_ref, w_ref, b_ref, o_ref, *, relu):
    acc = jnp.dot(x_ref[...], w_ref[...], preferred_element_type=jnp.float32)
    out = acc + b_ref[...]
    if relu:
        out = jnp.maximum(out, 0.0)
    o_ref[...] = out.astype(o_ref.dtype)


def _tile_m(m, kp):
    """Largest M tile (<=512) whose bf16 x-tile stays under ~6 MB."""
    tm = 512
    while tm > 128 and tm * kp * 2 > 6 * 1024 * 1024:
        tm //= 2
    mp8 = _round_up(m, 8)
    if mp8 <= tm:
        return mp8, mp8
    return _round_up(m, tm), tm


def _gemm(x2d, w2d, b2d, relu):
    m, k = x2d.shape
    kp, ncol = w2d.shape             # weights pre-padded: kp%128==0, ncol%128==0
    mp, tm = _tile_m(m, kp)
    tn = ncol if ncol <= 512 else 512
    x2d = jnp.pad(x2d, ((0, mp - m), (0, kp - k)))
    cost = pl.CostEstimate(
        flops=2 * mp * kp * ncol, transcendentals=0,
        bytes_accessed=2 * (mp * kp + kp * ncol + mp * ncol) + 4 * ncol)
    out = pl.pallas_call(
        functools.partial(_gemm_bias_act_kernel, relu=relu),
        out_shape=jax.ShapeDtypeStruct((mp, ncol), jnp.bfloat16),
        grid_spec=pltpu.PrefetchScalarGridSpec(
            num_scalar_prefetch=0,
            grid=(mp // tm, ncol // tn),
            in_specs=[pl.BlockSpec((tm, kp), lambda i, j: (i, 0)),
                      pl.BlockSpec((kp, tn), lambda i, j: (0, j)),
                      pl.BlockSpec((1, tn), lambda i, j: (0, j))],
            out_specs=pl.BlockSpec((tm, tn), lambda i, j: (i, j))),
        compiler_params=pltpu.CompilerParams(
            dimension_semantics=("parallel", "parallel"),
            vmem_limit_bytes=_VMEM_LIMIT),
        cost_estimate=cost,
    )(x2d, w2d, b2d)
    return out[:m]


def _im2col(x, kh, kw, stride, pad):
    """x: [N,H,W,C] -> patches [N,OH,OW,KH*KW,C]."""
    n, h, w, c = x.shape
    xp = jnp.pad(x, ((0, 0), (pad, pad), (pad, pad), (0, 0)))
    oh = (h + 2 * pad - kh) // stride + 1
    ow = (w + 2 * pad - kw) // stride + 1
    cols = []
    for i in range(kh):
        for j in range(kw):
            patch = jax.lax.slice(
                xp, (0, i, j, 0),
                (n, i + (oh - 1) * stride + 1, j + (ow - 1) * stride + 1, c),
                (1, stride, stride, 1))
            cols.append(patch)
    patches = jnp.stack(cols, axis=3)
    return patches, oh, ow


def conv_gemm(x, p, stride, pad, relu=True):
    """Conv + folded BN (+ReLU) via im2col + single-K-step Pallas GEMM.

    Only used for conv1 (7x7/s2) and the small stride-2 convs; the activation
    is sliced back to the real cin so no per-tap channel padding enters K.
    TODO(synk): fuse the window read here too (phase split for stride 2).
    """
    cin, kh, kw = p["cin"], p["kh"], p["kw"]
    x = x[..., :cin]
    n = x.shape[0]
    patches, oh, ow = _im2col(x, kh, kw, stride, pad)
    x2d = patches.reshape(n * oh * ow, kh * kw * cin)
    out = _gemm(x2d, p["w2d"], p["b2d"], relu)
    return out.reshape(n, oh, ow, p["cout"])


# ---------------------------------------------------------------------------
# Kernel 3: 3x3 / stride-2 / pad-1 max pool (bf16, phase-split windows)
# ---------------------------------------------------------------------------
def _maxpool_kernel(p00_ref, p01_ref, p10_ref, p11_ref, o_ref):
    _, oh, ow, _ = o_ref.shape
    phases = (p00_ref, p01_ref, p10_ref, p11_ref)
    out = None
    for i in range(3):
        for j in range(3):
            ref = phases[(i % 2) * 2 + (j % 2)]
            v = ref[0, pl.ds(i // 2, oh), pl.ds(j // 2, ow), :]
            out = v if out is None else jnp.maximum(out, v)
    o_ref[0] = out


def maxpool3x3_s2(x):
    n, h, w, c = x.shape
    oh = (h + 2 - 3) // 2 + 1
    ow = (w + 2 - 3) // 2 + 1
    neg = float(jnp.finfo(jnp.bfloat16).min)
    pad_b = 2 * oh + 2 - (h + 2)
    pad_r = 2 * ow + 2 - (w + 2)
    xp = jnp.pad(x, ((0, 0), (1, 1 + pad_b), (1, 1 + pad_r), (0, 0)),
                 constant_values=neg)
    # Stride-2 decimation once in XLA (~1x copy); all in-kernel reads are
    # unit-stride offset window slices.
    phases = [xp[:, a::2, b::2, :] for a in (0, 1) for b in (0, 1)]
    ph_spec = pl.BlockSpec((1, oh + 1, ow + 1, c), lambda ni: (ni, 0, 0, 0))
    return pl.pallas_call(
        _maxpool_kernel,
        out_shape=jax.ShapeDtypeStruct((n, oh, ow, c), x.dtype),
        grid_spec=pltpu.PrefetchScalarGridSpec(
            num_scalar_prefetch=0,
            grid=(n,),
            in_specs=[ph_spec] * 4,
            out_specs=pl.BlockSpec((1, oh, ow, c), lambda ni: (ni, 0, 0, 0))),
        compiler_params=pltpu.CompilerParams(
            dimension_semantics=("parallel",),
            vmem_limit_bytes=_VMEM_LIMIT),
    )(*phases)


# ---------------------------------------------------------------------------
# Deterministic raw parameters (resnet18, half_channel=False) + host-side prep
# ---------------------------------------------------------------------------
def _conv_bn_params(key, kh, kw, cin, cout):
    k1, k2, k3 = jax.random.split(key, 3)
    w = jax.random.normal(k1, (kh, kw, cin, cout), jnp.float32) * 0.05
    gamma = 1.0 + 0.1 * jax.random.normal(k2, (cout,), jnp.float32)
    beta = 0.1 * jax.random.normal(k3, (cout,), jnp.float32)
    eps = 1e-5
    # TODO(synk): synthetic eval-BN (running_mean=0, running_var=1); a real
    # checkpoint needs scale = gamma*rsqrt(var+eps), bias = beta - mean*scale.
    scale = gamma / jnp.sqrt(1.0 + eps)
    bias = beta
    return {"w": w, "scale": scale, "bias": bias}


def init_resnet18_params(key, in_channel=3):
    keys = iter(jax.random.split(key, 64))
    params = {"conv1": _conv_bn_params(next(keys), 7, 7, in_channel, 64)}
    channels = [64, 128, 256, 512]
    in_c = 64
    layers = []
    for li, out_c in enumerate(channels):
        stride = 1 if li == 0 else 2
        blocks = []
        for bi in range(2):
            s = stride if bi == 0 else 1
            block = {
                "conv1": _conv_bn_params(next(keys), 3, 3,
                                         in_c if bi == 0 else out_c, out_c),
                "conv2": _conv_bn_params(next(keys), 3, 3, out_c, out_c),
            }
            if bi == 0 and (s != 1 or in_c != out_c):
                block["down"] = _conv_bn_params(next(keys), 1, 1, in_c, out_c)
            blocks.append(block)
        layers.append(blocks)
        in_c = out_c
    params["layers"] = layers
    return params


def _fold_fused(raw):
    """3x3/s1 convs: taps-major [9*cin, cout_pad] bf16 weights, real cin on K."""
    w, scale, bias = raw["w"], raw["scale"], raw["bias"]
    kh, kw, cin, cout = w.shape
    cout_pad = _round_up(cout, _LANE)
    wf = w * scale[None, None, None, :]
    wf = jnp.pad(wf, ((0, 0), (0, 0), (0, 0), (0, cout_pad - cout)))
    b2d = jnp.pad(bias, (0, cout_pad - cout)).reshape(1, cout_pad)
    return {"w2d": wf.reshape(kh * kw * cin, cout_pad).astype(jnp.bfloat16),
            "b2d": b2d.astype(jnp.float32),
            "cin": cin, "cout": cout_pad}


def _fold_gemm(raw):
    """im2col-path convs: [K_pad, cout_pad] bf16 weights, K padded to 128x."""
    w, scale, bias = raw["w"], raw["scale"], raw["bias"]
    kh, kw, cin, cout = w.shape
    cout_pad = _round_up(cout, _LANE)
    wf = w * scale[None, None, None, :]
    wf = jnp.pad(wf, ((0, 0), (0, 0), (0, 0), (0, cout_pad - cout)))
    k = kh * kw * cin
    kp = _round_up(k, _LANE)
    w2d = jnp.pad(wf.reshape(k, cout_pad), ((0, kp - k), (0, 0)))
    b2d = jnp.pad(bias, (0, cout_pad - cout)).reshape(1, cout_pad)
    return {"w2d": w2d.astype(jnp.bfloat16),
            "b2d": b2d.astype(jnp.float32),
            "kh": kh, "kw": kw, "cin": cin, "cout": cout_pad}


def prepare_params(raw):
    prepped = {"conv1": _fold_gemm(raw["conv1"])}
    layers = []
    for li, blocks in enumerate(raw["layers"]):
        stride = 1 if li == 0 else 2
        new_blocks = []
        for bi, block in enumerate(blocks):
            s = stride if bi == 0 else 1
            nb = {
                "conv1": (_fold_gemm(block["conv1"]) if s == 2
                          else _fold_fused(block["conv1"])),
                "conv2": _fold_fused(block["conv2"]),
            }
            if "down" in block:
                nb["down"] = _fold_gemm(block["down"])
            new_blocks.append(nb)
        layers.append(new_blocks)
    prepped["layers"] = layers
    return prepped


# ---------------------------------------------------------------------------
# Forward pass (Encoder.forward == backbone forward, feature-map output)
# ---------------------------------------------------------------------------
def basic_block(x, block, stride):
    if stride == 2:
        out = conv_gemm(x, block["conv1"], stride=2, pad=1, relu=True)
        identity = conv_gemm(x, block["down"], stride=2, pad=0, relu=False)
    else:
        out = conv3x3_s1(x, block["conv1"], relu=True)
        identity = (conv_gemm(x, block["down"], stride=1, pad=0, relu=False)
                    if "down" in block else x)
    # TODO(synk): whole-BasicBlock fusion (single pallas_call) for layer3/4.
    return conv3x3_s1(out, block["conv2"], residual=identity)


def encoder_forward(params, x_nchw):
    # PyTorch NCHW f32 -> NHWC bf16 (lane-padded channels) -> NCHW f32 out.
    x = jnp.transpose(x_nchw, (0, 2, 3, 1)).astype(jnp.bfloat16)
    x = conv_gemm(x, params["conv1"], stride=2, pad=3, relu=True)
    x = maxpool3x3_s2(x)
    for li, blocks in enumerate(params["layers"]):
        stride = 1 if li == 0 else 2
        for bi, block in enumerate(blocks):
            s = stride if bi == 0 else 1
            x = basic_block(x, block, s)
    # TODO(synk): the custom BACKBONE['resnet18'] implementation is not given;
    # we return the layer4 feature map (no avgpool/fc), the usual encoder
    # convention.  512 channels need no lane padding.
    return jnp.transpose(x, (0, 3, 1, 2)).astype(jnp.float32)


if __name__ == "__main__":
    key = jax.random.PRNGKey(0)
    kx, kp = jax.random.split(key)
    x = jax.random.normal(kx, (2, 3, 32, 32), jnp.float32)  # small NCHW input
    raw = init_resnet18_params(kp, in_channel=3)
    params = prepare_params(raw)
    out = encoder_forward(params, x)
    jax.block_until_ready(out)
    assert out.shape == (2, 512, 1, 1), out.shape
    print("KERNEL_OK")
</pallas_src>

<mosaic_0001>
module attributes {stable_mosaic.version = 11 : i64} {
  func.func @_gemm_bias_act_kernel(%arg0: i32, %arg1: i32, %arg2: memref<512x256xbf16, #tpu.memory_space<vmem>>, %arg3: memref<256x128xbf16, #tpu.memory_space<vmem>>, %arg4: memref<1x128xf32, #tpu.memory_space<vmem>>, %arg5: memref<512x128xbf16, #tpu.memory_space<vmem>>) attributes {dimension_semantics = [#tpu.dimension_semantics<parallel>, #tpu.dimension_semantics<parallel>], iteration_bounds = array<i64: 1, 1>, scalar_prefetch = 0 : i64, scratch_operands = 0 : i64, tpu.core_type = #tpu.core_type<tc>, window_params = [{transform_indices = @transform_0, window_bounds = array<i64: 512, 256>}, {transform_indices = @transform_1, window_bounds = array<i64: 256, 128>}, {transform_indices = @transform_2, window_bounds = array<i64: 1, 128>}, {transform_indices = @transform_3, window_bounds = array<i64: 512, 128>}]} {
    %c0 = arith.constant 0 : index
    %c0_0 = arith.constant 0 : index
    %0 = vector.load %arg2[%c0, %c0_0] : memref<512x256xbf16, #tpu.memory_space<vmem>>, vector<512x256xbf16>
    %c0_1 = arith.constant 0 : index
    %c0_2 = arith.constant 0 : index
    %1 = vector.load %arg3[%c0_1, %c0_2] : memref<256x128xbf16, #tpu.memory_space<vmem>>, vector<256x128xbf16>
    %cst = arith.constant dense<0.000000e+00> : vector<512x128xf32>
    %2 = tpu.matmul %0, %1, %cst {dimension_numbers = #tpu.dot_dimension_numbers<[1], [0], [0], [1], [0, 0, 1, 1], [], []>} : vector<512x256xbf16>, vector<256x128xbf16>, vector<512x128xf32> -> vector<512x128xf32>
    %c0_3 = arith.constant 0 : index
    %c0_4 = arith.constant 0 : index
    %3 = vector.load %arg4[%c0_3, %c0_4] : memref<1x128xf32, #tpu.memory_space<vmem>>, vector<1x128xf32>
    %4 = vector.broadcast %3 : vector<1x128xf32> to vector<512x128xf32>
    %5 = arith.addf %2, %4 : vector<512x128xf32>
    %cst_5 = arith.constant 0.000000e+00 : f32
    %6 = vector.broadcast %cst_5 : f32 to vector<512x128xf32>
    %7 = arith.maximumf %5, %6 : vector<512x128xf32>
    %8 = arith.truncf %7 : vector<512x128xf32> to vector<512x128xbf16>
    %c0_6 = arith.constant 0 : index
    %c0_7 = arith.constant 0 : index
    %9 = vector.load %arg5[%c0_6, %c0_7] : memref<512x128xbf16, #tpu.memory_space<vmem>>, vector<512x128xbf16>
    tpu.vector_store %arg5[%c0_6, %c0_7], %8 {strides = array<i32>} : memref<512x128xbf16, #tpu.memory_space<vmem>>, vector<512x128xbf16>,
    return
  }
  func.func @transform_0(%arg0: i32, %arg1: i32) -> (i32, i32) {
    %c0_i32 = arith.constant 0 : i32
    %c0_i32_0 = arith.constant 0 : i32
    return %arg0, %c0_i32 : i32, i32
  }
  func.func @transform_1(%arg0: i32, %arg1: i32) -> (i32, i32) {
    %c0_i32 = arith.constant 0 : i32
    %c0_i32_0 = arith.constant 0 : i32
    return %c0_i32, %arg1 : i32, i32
  }
  func.func @transform_2(%arg0: i32, %arg1: i32) -> (i32, i32) {
    %c0_i32 = arith.constant 0 : i32
    %c0_i32_0 = arith.constant 0 : i32
    return %c0_i32, %arg1 : i32, i32
  }
  func.func @transform_3(%arg0: i32, %arg1: i32) -> (i32, i32) {
    %c0_i32 = arith.constant 0 : i32
    return %arg0, %arg1 : i32, i32
  }
}

</mosaic_0001>

<bundles_post_ra>
// kernel: tpu_custom_call.1
= control target key start
LH: loop header
LB: loop body
LE: loop exit
PB: predicated region body
PF: predicated region fallthrough
CT: control target
= control target key end

     0   :  { %8 = vsyncpa [#allocation3], 0  ;;  %s2016_s0 = inlined_call_operand.hbm [shape: bf16[512,256], index: 0, kind: input, shape index: {}]   ;;  %s2017_s1 = inlined_call_operand.hbm [shape: bf16[256,128], index: 1, kind: input, shape index: {}]   ;;  %s2018_s2 = inlined_call_operand.vmem [shape: f32[1,128], index: 2, kind: input, shape index: {}]   ;;  %s2019_s3 = inlined_call_operand.hbm [shape: bf16[512,128], index: 3, kind: output, shape index: {}]  }
   0x1   :  { %9 = vsyncpa [#allocation6], 0 }
   0x2   :  { %10 = vsyncpa [#allocation4], 0  ;;  %s1872_s12 = smov [#allocation2]  }
   0x3   :  { %s16_s13 = sshll.u32 %s1872_s12, 4  ;;  %s17_s13 = int_to_ptr.vmem [resolvable:$true] %s16_s13 }
   0x4   :  { %s1814_s14 = scalar_lea.vmem %s17_s13, 8192  ;;  %p1819_p1 = scmp.lt.s32.totalorder %s17_s13, %s17_s13 }
   0x5   :  { %p1815_p0 = scmp.ne.s32.totalorder %s17_s13, %s1814_s14  ;;  %p1820_p2 = scmp.lt.s32.totalorder %s1814_s14, %s1814_s14 }
   0x7   :  { %p1821_p3 = por %p1820_p2, %p1819_p1 }
   0x9   :  { %p1822_p4 = pnand %p1821_p3, %p1815_p0 }
   0xb   :  { %1825 = shalt.err (!%p1822_p4)
}
   0xc   :  { %s1873_s15 = smov 128   ;;  %s1874_s16 = smov 8  }
   0xd   :  { %22 = dma.hbm_to_vmem [thread:$0]  %s2016_s0, 8192, %s17_s13, [#allocation3], %s1873_s15, %s1873_s15, %s1874_s16  }
   0xe   :  { %s1875_s19 = smov [#allocation5]  }
   0xf   :  { %s28_s20 = sshll.u32 %s1875_s19, 4  ;;  %s29_s20 = int_to_ptr.vmem [resolvable:$true] %s28_s20 }
  0x10   :  { %s1834_s21 = scalar_lea.vmem %s29_s20, 2048  ;;  %p1839_p6 = scmp.lt.s32.totalorder %s29_s20, %s29_s20 }
  0x11   :  { %p1835_p5 = scmp.ne.s32.totalorder %s29_s20, %s1834_s21  ;;  %p1840_p7 = scmp.lt.s32.totalorder %s1834_s21, %s1834_s21 }
  0x13   :  { %p1841_p8 = por %p1840_p7, %p1839_p6 }
  0x15   :  { %p1842_p9 = pnand %p1841_p8, %p1835_p5 }
  0x17   :  { %1845 = shalt.err (!%p1842_p9)
}
  0x18   :  { %s1876_s22 = smov 64   ;;  %s1877_s23 = smov 4  }
  0x19   :  { %34 = dma.hbm_to_vmem [thread:$0]  %s2017_s1, 2048, %s29_s20, [#allocation6], %s1876_s22, %s1876_s22, %s1877_s23  }
  0x1a   :  { %1866 = dma.done.wait [#allocation3], 8192  }
  0x1b   :  { %1867 = vsyncadd [#allocation3], 4294959104 }
  0x1c   :  { %1868 = dma.done.wait [#allocation6], 2048  }
  0x1d   :  { %1869 = vsyncadd [#allocation6], 4294965248  ;;  %v1878_v0 = vmov 0   ;;  %v1694_v1 = vld [vmem:[#allocation5 + $0x38] sm:$0xff]   ;;  %v1695_v2 = vld [vmem:[#allocation5 + $0x30] sm:$0xff]  }
  0x1e   :  { %563 = vmatprep.subr.bf16.mxu0 %v1878_v0  ;;  %1654 = vmatprep.subr.bf16.mxu1 %v1878_v0  ;;  %v1696_v3 = vld [vmem:[#allocation5 + $0x28] sm:$0xff]   ;;  %v1697_v4 = vld [vmem:[#allocation5 + $0x20] sm:$0xff]   ;;  %v1698_v5 = vld [vmem:[#allocation5 + $0x18] sm:$0xff]  }
  0x1f   :  { %564 = vmatpush1.bf16.msra.mxu0 %v1694_v1  ;;  %1670 = vmatpush1.bf16.msra.mxu1 %v1694_v1  ;;  %v1712_v6 = vld [vmem:[#allocation2 + $0x4] ss:$8 sps:$4 sm:$0xff]   ;;  %v1699_v7 = vld [vmem:[#allocation5 + $0x10] sm:$0xff]   ;;  %v1702_v11 = vld [vmem:[#allocation5 + $0x78] sm:$0xff]  }
  0x20   :  { %565 = vmatprep.subr.bf16.mxu0 %v1878_v0  ;;  %1655 = vmatprep.subr.bf16.mxu1 %v1878_v0  ;;  %v1715_v8 = vld [vmem:[#allocation2 + $0x104] ss:$8 sps:$4 sm:$0xff]   ;;  %v1703_v12 = vld [vmem:[#allocation5 + $0x70] sm:$0xff]   ;;  %v1706_v15 = vld [vmem:[#allocation5 + $0x58] sm:$0xff]  }
  0x21   :  { %595 = vmatprep.mubr.bf16.mxu0 %v1712_v6  ;;  %723 = vmatprep.mubr.bf16.mxu1 %v1715_v8  ;;  %v1700_v9 = vld [vmem:[#allocation5 + $0x8] sm:$0xff]   ;;  %v1701_v10 = vld [vmem:[#allocation5] sm:$0xff]   ;;  %v1707_v16 = vld [vmem:[#allocation5 + $0x50] sm:$0xff]  }
  0x22   :  { %v1704_v13 = vld [vmem:[#allocation5 + $0x68] sm:$0xff]   ;;  %v1705_v14 = vld [vmem:[#allocation5 + $0x60] sm:$0xff]   ;;  %v1716_v21 = vld [vmem:[#allocation2 + $0x14] ss:$8 sps:$4 sm:$0xff]  }
  0x23   :  { %566 = vmatpush1.bf16.msra.mxu0 %v1695_v2  ;;  %1671 = vmatpush1.bf16.msra.mxu1 %v1695_v2  ;;  %v1708_v17 = vld [vmem:[#allocation5 + $0x48] sm:$0xff]   ;;  %v1709_v18 = vld [vmem:[#allocation5 + $0x40] sm:$0xff]   ;;  %v1718_v22 = vld [vmem:[#allocation2 + $0x114] ss:$8 sps:$4 sm:$0xff]  }
  0x24   :  { %567 = vmatprep.subr.bf16.mxu0 %v1878_v0  ;;  %1656 = vmatprep.subr.bf16.mxu1 %v1878_v0  ;;  %v1710_v19 = vld [vmem:[#allocation2] ss:$8 sps:$4 sm:$0xff]   ;;  %v1720_v23 = vld [vmem:[#allocation2 + $0x10] ss:$8 sps:$4 sm:$0xff]   ;;  %v1722_v25 = vld [vmem:[#allocation2 + $0x24] ss:$8 sps:$4 sm:$0xff]  }
  0x25   :  { %v1713_v20 = vld [vmem:[#allocation2 + $0x100] ss:$8 sps:$4 sm:$0xff]   ;;  %v1721_v24 = vld [vmem:[#allocation2 + $0x110] ss:$8 sps:$4 sm:$0xff]   ;;  %v1724_v26 = vld [vmem:[#allocation2 + $0x124] ss:$8 sps:$4 sm:$0xff]  }
  0x26   :  { %v1726_v27 = vld [vmem:[#allocation2 + $0x20] ss:$8 sps:$4 sm:$0xff]   ;;  %v1728_v29 = vld [vmem:[#allocation2 + $0x34] ss:$8 sps:$4 sm:$0xff]   ;;  %v1732_v31 = vld [vmem:[#allocation2 + $0x30] ss:$8 sps:$4 sm:$0xff]  }
  0x27   :  { %568 = vmatpush1.bf16.msra.mxu0 %v1696_v3  ;;  %1672 = vmatpush1.bf16.msra.mxu1 %v1696_v3  ;;  %v1727_v28 = vld [vmem:[#allocation2 + $0x120] ss:$8 sps:$4 sm:$0xff]   ;;  %v1730_v30 = vld [vmem:[#allocation2 + $0x134] ss:$8 sps:$4 sm:$0xff]   ;;  %v1733_v32 = vld [vmem:[#allocation2 + $0x130] ss:$8 sps:$4 sm:$0xff]  }
  0x28   :  { %569 = vmatprep.subr.bf16.mxu0 %v1878_v0  ;;  %1657 = vmatprep.subr.bf16.mxu1 %v1878_v0  ;;  %v1734_v33 = vld [vmem:[#allocation2 + $0x44] ss:$8 sps:$4 sm:$0xff]   ;;  %v1738_v35 = vld [vmem:[#allocation2 + $0x40] ss:$8 sps:$4 sm:$0xff]   ;;  %v1740_v37 = vld [vmem:[#allocation2 + $0x54] ss:$8 sps:$4 sm:$0xff]  }
  0x29   :  { %v1736_v34 = vld [vmem:[#allocation2 + $0x144] ss:$8 sps:$4 sm:$0xff]   ;;  %v1739_v36 = vld [vmem:[#allocation2 + $0x140] ss:$8 sps:$4 sm:$0xff]   ;;  %v1742_v38 = vld [vmem:[#allocation2 + $0x154] ss:$8 sps:$4 sm:$0xff]  }
  0x2a   :  { %v1744_v39 = vld [vmem:[#allocation2 + $0x50] ss:$8 sps:$4 sm:$0xff]   ;;  %v1746_v41 = vld [vmem:[#allocation2 + $0x64] ss:$8 sps:$4 sm:$0xff]   ;;  %v1750_v43 = vld [vmem:[#allocation2 + $0x60] ss:$8 sps:$4 sm:$0xff]  }
  0x2b   :  { %570 = vmatpush1.bf16.msra.mxu0 %v1697_v4  ;;  %1673 = vmatpush1.bf16.msra.mxu1 %v1697_v4  ;;  %v1745_v40 = vld [vmem:[#allocation2 + $0x150] ss:$8 sps:$4 sm:$0xff]   ;;  %v1748_v42 = vld [vmem:[#allocation2 + $0x164] ss:$8 sps:$4 sm:$0xff]   ;;  %v1751_v44 = vld [vmem:[#allocation2 + $0x160] ss:$8 sps:$4 sm:$0xff]  }
  0x2c   :  { %571 = vmatprep.subr.bf16.mxu0 %v1878_v0  ;;  %1658 = vmatprep.subr.bf16.mxu1 %v1878_v0  ;;  %v1752_v45 = vld [vmem:[#allocation2 + $0x74] ss:$8 sps:$4 sm:$0xff]   ;;  %v1756_v47 = vld [vmem:[#allocation2 + $0x70] ss:$8 sps:$4 sm:$0xff]   ;;  %v1758_v49 = vld [vmem:[#allocation2 + $0x84] ss:$8 sps:$4 sm:$0xff]  }
  0x2d   :  { %v1754_v46 = vld [vmem:[#allocation2 + $0x174] ss:$8 sps:$4 sm:$0xff]   ;;  %v1757_v48 = vld [vmem:[#allocation2 + $0x170] ss:$8 sps:$4 sm:$0xff]   ;;  %v1760_v50 = vld [vmem:[#allocation2 + $0x184] ss:$8 sps:$4 sm:$0xff]  }
  0x2e   :  { %v1762_v51 = vld [vmem:[#allocation2 + $0x80] ss:$8 sps:$4 sm:$0xff]   ;;  %v1764_v53 = vld [vmem:[#allocation2 + $0x94] ss:$8 sps:$4 sm:$0xff]   ;;  %v1768_v55 = vld [vmem:[#allocation2 + $0x90] ss:$8 sps:$4 sm:$0xff]  }
  0x2f   :  { %572 = vmatpush1.bf16.msra.mxu0 %v1698_v5  ;;  %1674 = vmatpush1.bf16.msra.mxu1 %v1698_v5  ;;  %v1763_v52 = vld [vmem:[#allocation2 + $0x180] ss:$8 sps:$4 sm:$0xff]   ;;  %v1766_v54 = vld [vmem:[#allocation2 + $0x194] ss:$8 sps:$4 sm:$0xff]   ;;  %v1769_v56 = vld [vmem:[#allocation2 + $0x190] ss:$8 sps:$4 sm:$0xff]  }
  0x30   :  { %573 = vmatprep.subr.bf16.mxu0 %v1878_v0  ;;  %1659 = vmatprep.subr.bf16.mxu1 %v1878_v0  ;;  %v1770_v57 = vld [vmem:[#allocation2 + $0xa4] ss:$8 sps:$4 sm:$0xff]   ;;  %v1774_v59 = vld [vmem:[#allocation2 + $0xa0] ss:$8 sps:$4 sm:$0xff]   ;;  %v1776_v61 = vld [vmem:[#allocation2 + $0xb4] ss:$8 sps:$4 sm:$0xff]  }
  0x31   :  { %v1772_v58 = vld [vmem:[#allocation2 + $0x1a4] ss:$8 sps:$4 sm:$0xff]   ;;  %v1775_v60 = vld [vmem:[#allocation2 + $0x1a0] ss:$8 sps:$4 sm:$0xff]   ;;  %v1778_v62 = vld [vmem:[#allocation2 + $0x1b4] ss:$8 sps:$4 sm:$0xff]  }
  0x32   :  { %v1780_v63 = vld [vmem:[#allocation2 + $0xb0] ss:$8 sps:$4 sm:$0xff]   ;;  %v1782_v1 = vld [vmem:[#allocation2 + $0xc4] ss:$8 sps:$4 sm:$0xff]   ;;  %v1786_v3 = vld [vmem:[#allocation2 + $0xc0] ss:$8 sps:$4 sm:$0xff]  }
  0x33   :  { %574 = vmatpush1.bf16.msra.mxu0 %v1699_v7  ;;  %1675 = vmatpush1.bf16.msra.mxu1 %v1699_v7  ;;  %v1784_v2 = vld [vmem:[#allocation2 + $0x1c4] ss:$8 sps:$4 sm:$0xff]   ;;  %v1787_v4 = vld [vmem:[#allocation2 + $0x1c0] ss:$8 sps:$4 sm:$0xff]   ;;  %v1788_v5 = vld [vmem:[#allocation2 + $0xd4] ss:$8 sps:$4 sm:$0xff]  }
  0x34   :  { %575 = vmatprep.subr.bf16.mxu0 %v1878_v0  ;;  %1660 = vmatprep.subr.bf16.mxu1 %v1878_v0  ;;  %v1790_v6 = vld [vmem:[#allocation2 + $0x1d4] ss:$8 sps:$4 sm:$0xff]   ;;  %v1792_v7 = vld [vmem:[#allocation2 + $0xd0] ss:$8 sps:$4 sm:$0xff]  }
  0x35   :  { %v1793_v8 = vld [vmem:[#allocation2 + $0x1d0] ss:$8 sps:$4 sm:$0xff]  }
  0x37   :  { %576 = vmatpush1.bf16.msra.mxu0 %v1700_v9  ;;  %1676 = vmatpush1.bf16.msra.mxu1 %v1700_v9  ;;  %v1794_v9 = vld [vmem:[#allocation2 + $0xe4] ss:$8 sps:$4 sm:$0xff]  }
  0x38   :  { %577 = vmatprep.subr.bf16.mxu0 %v1878_v0  ;;  %1661 = vmatprep.subr.bf16.mxu1 %v1878_v0 }
  0x3b   :  { %578 = vmatpush1.bf16.msra.mxu0 %v1701_v10  ;;  %1677 = vmatpush1.bf16.msra.mxu1 %v1701_v10  ;;  %v1796_v10 = vld [vmem:[#allocation2 + $0x1e4] ss:$8 sps:$4 sm:$0xff]  }
  0x3c   :  { %579 = vmatprep.subr.bf16.mxu0 %v1878_v0  ;;  %1662 = vmatprep.subr.bf16.mxu1 %v1878_v0 }
  0x3f   :  { %580 = vmatpush2.bf16.msra.mxu0 %v1702_v11  ;;  %1678 = vmatpush2.bf16.msra.mxu1 %v1702_v11  ;;  %v1798_v11 = vld [vmem:[#allocation2 + $0xe0] ss:$8 sps:$4 sm:$0xff]  }
  0x40   :  { %581 = vmatprep.subr.bf16.mxu0 %v1878_v0  ;;  %1663 = vmatprep.subr.bf16.mxu1 %v1878_v0 }
  0x43   :  { %582 = vmatpush2.bf16.msra.mxu0 %v1703_v12  ;;  %1679 = vmatpush2.bf16.msra.mxu1 %v1703_v12  ;;  %v1799_v12 = vld [vmem:[#allocation2 + $0x1e0] ss:$8 sps:$4 sm:$0xff]  }
  0x44   :  { %583 = vmatprep.subr.bf16.mxu0 %v1878_v0  ;;  %1664 = vmatprep.subr.bf16.mxu1 %v1878_v0 }
  0x47   :  { %584 = vmatpush2.bf16.msra.mxu0 %v1704_v13  ;;  %1680 = vmatpush2.bf16.msra.mxu1 %v1704_v13  ;;  %v1800_v13 = vld [vmem:[#allocation2 + $0xf4] ss:$8 sps:$4 sm:$0xff]  }
  0x48   :  { %585 = vmatprep.subr.bf16.mxu0 %v1878_v0  ;;  %1665 = vmatprep.subr.bf16.mxu1 %v1878_v0 }
  0x4b   :  { %586 = vmatpush2.bf16.msra.mxu0 %v1705_v14  ;;  %1681 = vmatpush2.bf16.msra.mxu1 %v1705_v14  ;;  %v1802_v14 = vld [vmem:[#allocation2 + $0x1f4] ss:$8 sps:$4 sm:$0xff]  }
  0x4c   :  { %587 = vmatprep.subr.bf16.mxu0 %v1878_v0  ;;  %1666 = vmatprep.subr.bf16.mxu1 %v1878_v0 }
  0x4f   :  { %588 = vmatpush2.bf16.msra.mxu0 %v1706_v15  ;;  %1682 = vmatpush2.bf16.msra.mxu1 %v1706_v15  ;;  %v1804_v15 = vld [vmem:[#allocation2 + $0xf0] ss:$8 sps:$4 sm:$0xff]  }
  0x50   :  { %589 = vmatprep.subr.bf16.mxu0 %v1878_v0  ;;  %1667 = vmatprep.subr.bf16.mxu1 %v1878_v0 }
  0x53   :  { %590 = vmatpush2.bf16.msra.mxu0 %v1707_v16  ;;  %1683 = vmatpush2.bf16.msra.mxu1 %v1707_v16  ;;  %v1805_v16 = vld [vmem:[#allocation2 + $0x1f0] ss:$8 sps:$4 sm:$0xff]  }
  0x54   :  { %591 = vmatprep.subr.bf16.mxu0 %v1878_v0  ;;  %1668 = vmatprep.subr.bf16.mxu1 %v1878_v0 }
  0x57   :  { %592 = vmatpush2.bf16.msra.mxu0 %v1708_v17  ;;  %1684 = vmatpush2.bf16.msra.mxu1 %v1708_v17  ;;  %v1944_v17 = vld [vmem:[%s2018_s2] ss:$0 sm:$0xff]  ;;  %s1879_s2 = smov [#allocation7]  }
  0x58   :  { %593 = vmatprep.subr.bf16.mxu0 %v1878_v0  ;;  %1669 = vmatprep.subr.bf16.mxu1 %v1878_v0  ;;  %v1781_v0 = vld [vmem:[#allocation2 + $0x1b0] ss:$8 sps:$4 sm:$0xff]   ;;  %s1241_s26 = sshll.u32 %s1879_s2, 4  ;;  %s1242_s26 = int_to_ptr.vmem [resolvable:$true] %s1241_s26 }
  0x59   :  { %s1846_s27 = scalar_lea.vmem %s1242_s26, 4096  ;;  %p1851_p11 = scmp.lt.s32.totalorder %s1242_s26, %s1242_s26 }
  0x5a   :  { %p1847_p10 = scmp.ne.s32.totalorder %s1242_s26, %s1846_s27  ;;  %p1852_p12 = scmp.lt.s32.totalorder %s1846_s27, %s1846_s27 }
  0x5b   :  { %594 = vmatpush2.bf16.msra.mxu0 %v1709_v18  ;;  %1685 = vmatpush2.bf16.msra.mxu1 %v1709_v18 }
  0x5c   :  { %p1853_p13 = por %p1852_p12, %p1851_p11 }
  0x5e   :  { %596 = vmatmul.mubr.bf16.vlgmr.msra.gmra.mxu0 %v1710_v19  ;;  %724 = vmatmul.mubr.bf16.vlgmr.msra.gmra.mxu1 %v1713_v20  ;;  %p1854_p0 = pnand %p1853_p13, %p1847_p10 }
  0x5f   :  { %603 = vmatprep.mubr.bf16.mxu0 %v1716_v21  ;;  %731 = vmatprep.mubr.bf16.mxu1 %v1718_v22 }
  0x66   :  { %604 = vmatmul.mubr.bf16.gmra.mxu0 %v1720_v23  ;;  %732 = vmatmul.mubr.bf16.gmra.mxu1 %v1721_v24 }
  0x67   :  { %611 = vmatprep.mubr.bf16.mxu0 %v1722_v25  ;;  %739 = vmatprep.mubr.bf16.mxu1 %v1724_v26 }
  0x6e   :  { %612 = vmatmul.mubr.bf16.gmra.mxu0 %v1726_v27  ;;  %740 = vmatmul.mubr.bf16.gmra.mxu1 %v1727_v28 }
  0x6f   :  { %619 = vmatprep.mubr.bf16.mxu0 %v1728_v29  ;;  %747 = vmatprep.mubr.bf16.mxu1 %v1730_v30 }
  0x76   :  { %620 = vmatmul.mubr.bf16.gmra.mxu0 %v1732_v31  ;;  %748 = vmatmul.mubr.bf16.gmra.mxu1 %v1733_v32 }
  0x77   :  { %627 = vmatprep.mubr.bf16.mxu0 %v1734_v33  ;;  %755 = vmatprep.mubr.bf16.mxu1 %v1736_v34 }
  0x7e   :  { %628 = vmatmul.mubr.bf16.gmra.mxu0 %v1738_v35  ;;  %756 = vmatmul.mubr.bf16.gmra.mxu1 %v1739_v36 }
  0x7f   :  { %635 = vmatprep.mubr.bf16.mxu0 %v1740_v37  ;;  %763 = vmatprep.mubr.bf16.mxu1 %v1742_v38 }
  0x86   :  { %636 = vmatmul.mubr.bf16.gmra.mxu0 %v1744_v39  ;;  %764 = vmatmul.mubr.bf16.gmra.mxu1 %v1745_v40 }
  0x87   :  { %643 = vmatprep.mubr.bf16.mxu0 %v1746_v41  ;;  %771 = vmatprep.mubr.bf16.mxu1 %v1748_v42 }
  0x8e   :  { %644 = vmatmul.mubr.bf16.gmra.mxu0 %v1750_v43  ;;  %772 = vmatmul.mubr.bf16.gmra.mxu1 %v1751_v44 }
  0x8f   :  { %651 = vmatprep.mubr.bf16.mxu0 %v1752_v45  ;;  %779 = vmatprep.mubr.bf16.mxu1 %v1754_v46 }
  0x96   :  { %652 = vmatmul.mubr.bf16.gmra.mxu0 %v1756_v47  ;;  %780 = vmatmul.mubr.bf16.gmra.mxu1 %v1757_v48 }
  0x97   :  { %659 = vmatprep.mubr.bf16.mxu0 %v1758_v49  ;;  %787 = vmatprep.mubr.bf16.mxu1 %v1760_v50 }
  0x9e   :  { %660 = vmatmul.mubr.bf16.gmra.mxu0 %v1762_v51  ;;  %788 = vmatmul.mubr.bf16.gmra.mxu1 %v1763_v52 }
  0x9f   :  { %667 = vmatprep.mubr.bf16.mxu0 %v1764_v53  ;;  %795 = vmatprep.mubr.bf16.mxu1 %v1766_v54 }
  0xa6   :  { %668 = vmatmul.mubr.bf16.gmra.mxu0 %v1768_v55  ;;  %796 = vmatmul.mubr.bf16.gmra.mxu1 %v1769_v56 }
  0xa7   :  { %675 = vmatprep.mubr.bf16.mxu0 %v1770_v57  ;;  %803 = vmatprep.mubr.bf16.mxu1 %v1772_v58 }
  0xae   :  { %676 = vmatmul.mubr.bf16.gmra.mxu0 %v1774_v59  ;;  %804 = vmatmul.mubr.bf16.gmra.mxu1 %v1775_v60 }
  0xaf   :  { %683 = vmatprep.mubr.bf16.mxu0 %v1776_v61  ;;  %811 = vmatprep.mubr.bf16.mxu1 %v1778_v62 }
  0xb6   :  { %684 = vmatmul.mubr.bf16.gmra.mxu0 %v1780_v63  ;;  %812 = vmatmul.mubr.bf16.gmra.mxu1 %v1781_v0 }
  0xb7   :  { %691 = vmatprep.mubr.bf16.mxu0 %v1782_v1  ;;  %819 = vmatprep.mubr.bf16.mxu1 %v1784_v2 }
  0xbe   :  { %692 = vmatmul.mubr.bf16.gmra.mxu0 %v1786_v3  ;;  %820 = vmatmul.mubr.bf16.gmra.mxu1 %v1787_v4 }
  0xbf   :  { %699 = vmatprep.mubr.bf16.mxu0 %v1788_v5  ;;  %827 = vmatprep.mubr.bf16.mxu1 %v1790_v6 }
  0xc6   :  { %700 = vmatmul.mubr.bf16.gmra.mxu0 %v1792_v7  ;;  %828 = vmatmul.mubr.bf16.gmra.mxu1 %v1793_v8 }
  0xc7   :  { %707 = vmatprep.mubr.bf16.mxu0 %v1794_v9  ;;  %835 = vmatprep.mubr.bf16.mxu1 %v1796_v10 }
  0xce   :  { %708 = vmatmul.mubr.bf16.gmra.mxu0 %v1798_v11  ;;  %836 = vmatmul.mubr.bf16.gmra.mxu1 %v1799_v12 }
  0xcf   :  { %715 = vmatprep.mubr.bf16.mxu0 %v1800_v13  ;;  %843 = vmatprep.mubr.bf16.mxu1 %v1802_v14 }
  0xd6   :  { %716 = vmatmul.mubr.bf16.gmra.mxu0 %v1804_v15  ;;  %844 = vmatmul.mubr.bf16.gmra.mxu1 %v1805_v16 }
 0x11e   :  { %v597_v18 = vpop.f32.mrf.mxu0  ;;  %v725_v19 = vpop.f32.mrf.mxu1 }
 0x11f   :  { %v598_v22 = vadd.f32 %v1944_v17, %v597_v18  ;;  %v726_v23 = vadd.f32 %v1944_v17, %v725_v19 }
 0x120   :  { %v599_v20 = vpop.f32.mrf.mxu0  ;;  %v727_v21 = vpop.f32.mrf.mxu1 }
 0x121   :  { %v852_v30 = vmax.f32 %v598_v22, 0.0  ;;  %v884_v31 = vmax.f32 %v726_v23, 0.0 }
 0x122   :  { %v600_v24 = vpop.f32.mrf.mxu0  ;;  %v728_v25 = vpop.f32.mrf.mxu1 }
 0x123   :  { %v601_v26 = vadd.f32 %v1944_v17, %v600_v24  ;;  %v729_v27 = vadd.f32 %v1944_v17, %v728_v25 }
 0x124   :  { %v602_v28 = vpop.f32.mrf.mxu0  ;;  %v730_v29 = vpop.f32.mrf.mxu1 }
 0x125   :  { %v853_v32 = vmax.f32 %v601_v26, 0.0  ;;  %v885_v33 = vmax.f32 %v729_v27, 0.0 }
 0x126   :  { %v605_v34 = vpop.f32.mrf.mxu0  ;;  %v733_v35 = vpop.f32.mrf.mxu1 }
 0x127   :  { %v1466_v36 = vpack.c.bf16 %v853_v32, %v852_v30  ;;  %v1546_v37 = vpack.c.bf16 %v885_v33, %v884_v31  ;;  %v606_v40 = vadd.f32 %v1944_v17, %v605_v34  ;;  %v734_v41 = vadd.f32 %v1944_v17, %v733_v35 }
 0x128   :  { %v607_v38 = vpop.f32.mrf.mxu0  ;;  %v735_v39 = vpop.f32.mrf.mxu1 }
 0x129   :  { %1467 = vst [vmem:[#allocation7] sm:$0xff] %v1466_v36   ;;  %1638 = vst [vmem:[#allocation7 + $0x80] sm:$0xff] %v1546_v37   ;;  %v854_v48 = vmax.f32 %v606_v40, 0.0  ;;  %v886_v49 = vmax.f32 %v734_v41, 0.0 }
 0x12a   :  { %v608_v42 = vpop.f32.mrf.mxu0  ;;  %v736_v43 = vpop.f32.mrf.mxu1 }
 0x12b   :  { %v609_v44 = vadd.f32 %v1944_v17, %v608_v42  ;;  %v737_v45 = vadd.f32 %v1944_v17, %v736_v43 }
 0x12c   :  { %v610_v46 = vpop.f32.mrf.mxu0  ;;  %v738_v47 = vpop.f32.mrf.mxu1 }
 0x12d   :  { %v855_v50 = vmax.f32 %v609_v44, 0.0  ;;  %v887_v51 = vmax.f32 %v737_v45, 0.0 }
 0x12e   :  { %v613_v52 = vpop.f32.mrf.mxu0  ;;  %v741_v53 = vpop.f32.mrf.mxu1 }
 0x12f   :  { %v1471_v54 = vpack.c.bf16 %v855_v50, %v854_v48  ;;  %v1551_v55 = vpack.c.bf16 %v887_v51, %v886_v49  ;;  %v614_v58 = vadd.f32 %v1944_v17, %v613_v52  ;;  %v742_v59 = vadd.f32 %v1944_v17, %v741_v53 }
 0x130   :  { %v615_v56 = vpop.f32.mrf.mxu0  ;;  %v743_v57 = vpop.f32.mrf.mxu1 }
 0x131   :  { %1623 = vst [vmem:[#allocation7 + $0x8] sm:$0xff] %v1471_v54   ;;  %1639 = vst [vmem:[#allocation7 + $0x88] sm:$0xff] %v1551_v55   ;;  %v856_v2 = vmax.f32 %v614_v58, 0.0  ;;  %v888_v3 = vmax.f32 %v742_v59, 0.0 }
 0x132   :  { %v616_v60 = vpop.f32.mrf.mxu0  ;;  %v744_v61 = vpop.f32.mrf.mxu1 }
 0x133   :  { %v617_v62 = vadd.f32 %v1944_v17, %v616_v60  ;;  %v745_v63 = vadd.f32 %v1944_v17, %v744_v61 }
 0x134   :  { %v618_v0 = vpop.f32.mrf.mxu0  ;;  %v746_v1 = vpop.f32.mrf.mxu1 }
 0x135   :  { %v857_v4 = vmax.f32 %v617_v62, 0.0  ;;  %v889_v5 = vmax.f32 %v745_v63, 0.0 }
 0x136   :  { %v621_v6 = vpop.f32.mrf.mxu0  ;;  %v749_v7 = vpop.f32.mrf.mxu1 }
 0x137   :  { %v1476_v8 = vpack.c.bf16 %v857_v4, %v856_v2  ;;  %v1556_v9 = vpack.c.bf16 %v889_v5, %v888_v3  ;;  %v622_v12 = vadd.f32 %v1944_v17, %v621_v6  ;;  %v750_v13 = vadd.f32 %v1944_v17, %v749_v7 }
 0x138   :  { %v623_v10 = vpop.f32.mrf.mxu0  ;;  %v751_v11 = vpop.f32.mrf.mxu1 }
 0x139   :  { %1624 = vst [vmem:[#allocation7 + $0x10] sm:$0xff] %v1476_v8   ;;  %1640 = vst [vmem:[#allocation7 + $0x90] sm:$0xff] %v1556_v9   ;;  %v858_v21 = vmax.f32 %v622_v12, 0.0  ;;  %v890_v22 = vmax.f32 %v750_v13, 0.0 }
 0x13a   :  { %v624_v14 = vpop.f32.mrf.mxu0  ;;  %v752_v15 = vpop.f32.mrf.mxu1 }
 0x13b   :  { %v625_v16 = vadd.f32 %v1944_v17, %v624_v14  ;;  %v753_v18 = vadd.f32 %v1944_v17, %v752_v15 }
 0x13c   :  { %v626_v19 = vpop.f32.mrf.mxu0  ;;  %v754_v20 = vpop.f32.mrf.mxu1 }
 0x13d   :  { %v859_v23 = vmax.f32 %v625_v16, 0.0  ;;  %v891_v24 = vmax.f32 %v753_v18, 0.0 }
 0x13e   :  { %v629_v25 = vpop.f32.mrf.mxu0  ;;  %v757_v26 = vpop.f32.mrf.mxu1 }
 0x13f   :  { %v1481_v27 = vpack.c.bf16 %v859_v23, %v858_v21  ;;  %v1561_v28 = vpack.c.bf16 %v891_v24, %v890_v22  ;;  %v630_v31 = vadd.f32 %v1944_v17, %v629_v25  ;;  %v758_v32 = vadd.f32 %v1944_v17, %v757_v26 }
 0x140   :  { %v631_v29 = vpop.f32.mrf.mxu0  ;;  %v759_v30 = vpop.f32.mrf.mxu1 }
 0x141   :  { %1625 = vst [vmem:[#allocation7 + $0x18] sm:$0xff] %v1481_v27   ;;  %1641 = vst [vmem:[#allocation7 + $0x98] sm:$0xff] %v1561_v28   ;;  %v860_v39 = vmax.f32 %v630_v31, 0.0  ;;  %v892_v40 = vmax.f32 %v758_v32, 0.0 }
 0x142   :  { %v632_v33 = vpop.f32.mrf.mxu0  ;;  %v760_v34 = vpop.f32.mrf.mxu1 }
 0x143   :  { %v633_v35 = vadd.f32 %v1944_v17, %v632_v33  ;;  %v761_v36 = vadd.f32 %v1944_v17, %v760_v34 }
 0x144   :  { %v634_v37 = vpop.f32.mrf.mxu0  ;;  %v762_v38 = vpop.f32.mrf.mxu1 }
 0x145   :  { %v861_v41 = vmax.f32 %v633_v35, 0.0  ;;  %v893_v42 = vmax.f32 %v761_v36, 0.0 }
 0x146   :  { %v637_v43 = vpop.f32.mrf.mxu0  ;;  %v765_v44 = vpop.f32.mrf.mxu1 }
 0x147   :  { %v1486_v45 = vpack.c.bf16 %v861_v41, %v860_v39  ;;  %v1566_v46 = vpack.c.bf16 %v893_v42, %v892_v40  ;;  %v638_v49 = vadd.f32 %v1944_v17, %v637_v43  ;;  %v766_v50 = vadd.f32 %v1944_v17, %v765_v44 }
 0x148   :  { %v639_v47 = vpop.f32.mrf.mxu0  ;;  %v767_v48 = vpop.f32.mrf.mxu1 }
 0x149   :  { %1626 = vst [vmem:[#allocation7 + $0x20] sm:$0xff] %v1486_v45   ;;  %1642 = vst [vmem:[#allocation7 + $0xa0] sm:$0xff] %v1566_v46   ;;  %v862_v57 = vmax.f32 %v638_v49, 0.0  ;;  %v894_v58 = vmax.f32 %v766_v50, 0.0 }
 0x14a   :  { %v640_v51 = vpop.f32.mrf.mxu0  ;;  %v768_v52 = vpop.f32.mrf.mxu1 }
 0x14b   :  { %v641_v53 = vadd.f32 %v1944_v17, %v640_v51  ;;  %v769_v54 = vadd.f32 %v1944_v17, %v768_v52 }
 0x14c   :  { %v642_v55 = vpop.f32.mrf.mxu0  ;;  %v770_v56 = vpop.f32.mrf.mxu1 }
 0x14d   :  { %v863_v59 = vmax.f32 %v641_v53, 0.0  ;;  %v895_v60 = vmax.f32 %v769_v54, 0.0 }
 0x14e   :  { %v645_v61 = vpop.f32.mrf.mxu0  ;;  %v773_v62 = vpop.f32.mrf.mxu1 }
 0x14f   :  { %v1491_v63 = vpack.c.bf16 %v863_v59, %v862_v57  ;;  %v1571_v0 = vpack.c.bf16 %v895_v60, %v894_v58  ;;  %v646_v3 = vadd.f32 %v1944_v17, %v645_v61  ;;  %v774_v4 = vadd.f32 %v1944_v17, %v773_v62 }
 0x150   :  { %v647_v1 = vpop.f32.mrf.mxu0  ;;  %v775_v2 = vpop.f32.mrf.mxu1 }
 0x151   :  { %1627 = vst [vmem:[#allocation7 + $0x28] sm:$0xff] %v1491_v63   ;;  %1643 = vst [vmem:[#allocation7 + $0xa8] sm:$0xff] %v1571_v0   ;;  %v864_v11 = vmax.f32 %v646_v3, 0.0  ;;  %v896_v12 = vmax.f32 %v774_v4, 0.0 }
 0x152   :  { %v648_v5 = vpop.f32.mrf.mxu0  ;;  %v776_v6 = vpop.f32.mrf.mxu1 }
 0x153   :  { %v649_v7 = vadd.f32 %v1944_v17, %v648_v5  ;;  %v777_v8 = vadd.f32 %v1944_v17, %v776_v6 }
 0x154   :  { %v650_v9 = vpop.f32.mrf.mxu0  ;;  %v778_v10 = vpop.f32.mrf.mxu1 }
 0x155   :  { %v865_v13 = vmax.f32 %v649_v7, 0.0  ;;  %v897_v14 = vmax.f32 %v777_v8, 0.0 }
 0x156   :  { %v653_v15 = vpop.f32.mrf.mxu0  ;;  %v781_v16 = vpop.f32.mrf.mxu1 }
 0x157   :  { %v1496_v18 = vpack.c.bf16 %v865_v13, %v864_v11  ;;  %v1576_v19 = vpack.c.bf16 %v897_v14, %v896_v12  ;;  %v654_v22 = vadd.f32 %v1944_v17, %v653_v15  ;;  %v782_v23 = vadd.f32 %v1944_v17, %v781_v16 }
 0x158   :  { %v655_v20 = vpop.f32.mrf.mxu0  ;;  %v783_v21 = vpop.f32.mrf.mxu1 }
 0x159   :  { %1628 = vst [vmem:[#allocation7 + $0x30] sm:$0xff] %v1496_v18   ;;  %1644 = vst [vmem:[#allocation7 + $0xb0] sm:$0xff] %v1576_v19   ;;  %v866_v30 = vmax.f32 %v654_v22, 0.0  ;;  %v898_v31 = vmax.f32 %v782_v23, 0.0 }
 0x15a   :  { %v656_v24 = vpop.f32.mrf.mxu0  ;;  %v784_v25 = vpop.f32.mrf.mxu1 }
 0x15b   :  { %v657_v26 = vadd.f32 %v1944_v17, %v656_v24  ;;  %v785_v27 = vadd.f32 %v1944_v17, %v784_v25 }
 0x15c   :  { %v658_v28 = vpop.f32.mrf.mxu0  ;;  %v786_v29 = vpop.f32.mrf.mxu1 }
 0x15d   :  { %v867_v32 = vmax.f32 %v657_v26, 0.0  ;;  %v899_v33 = vmax.f32 %v785_v27, 0.0 }
 0x15e   :  { %v661_v34 = vpop.f32.mrf.mxu0  ;;  %v789_v35 = vpop.f32.mrf.mxu1 }
 0x15f   :  { %v1501_v36 = vpack.c.bf16 %v867_v32, %v866_v30  ;;  %v1581_v37 = vpack.c.bf16 %v899_v33, %v898_v31  ;;  %v662_v40 = vadd.f32 %v1944_v17, %v661_v34  ;;  %v790_v41 = vadd.f32 %v1944_v17, %v789_v35 }
 0x160   :  { %v663_v38 = vpop.f32.mrf.mxu0  ;;  %v791_v39 = vpop.f32.mrf.mxu1 }
 0x161   :  { %1629 = vst [vmem:[#allocation7 + $0x38] sm:$0xff] %v1501_v36   ;;  %1645 = vst [vmem:[#allocation7 + $0xb8] sm:$0xff] %v1581_v37   ;;  %v868_v48 = vmax.f32 %v662_v40, 0.0  ;;  %v900_v49 = vmax.f32 %v790_v41, 0.0 }
 0x162   :  { %v664_v42 = vpop.f32.mrf.mxu0  ;;  %v792_v43 = vpop.f32.mrf.mxu1 }
 0x163   :  { %v665_v44 = vadd.f32 %v1944_v17, %v664_v42  ;;  %v793_v45 = vadd.f32 %v1944_v17, %v792_v43 }
 0x164   :  { %v666_v46 = vpop.f32.mrf.mxu0  ;;  %v794_v47 = vpop.f32.mrf.mxu1 }
 0x165   :  { %v869_v50 = vmax.f32 %v665_v44, 0.0  ;;  %v901_v51 = vmax.f32 %v793_v45, 0.0 }
 0x166   :  { %v669_v52 = vpop.f32.mrf.mxu0  ;;  %v797_v53 = vpop.f32.mrf.mxu1 }
 0x167   :  { %v1506_v54 = vpack.c.bf16 %v869_v50, %v868_v48  ;;  %v1586_v55 = vpack.c.bf16 %v901_v51, %v900_v49  ;;  %v670_v58 = vadd.f32 %v1944_v17, %v669_v52  ;;  %v798_v59 = vadd.f32 %v1944_v17, %v797_v53 }
 0x168   :  { %v671_v56 = vpop.f32.mrf.mxu0  ;;  %v799_v57 = vpop.f32.mrf.mxu1 }
 0x169   :  { %1630 = vst [vmem:[#allocation7 + $0x40] sm:$0xff] %v1506_v54   ;;  %1646 = vst [vmem:[#allocation7 + $0xc0] sm:$0xff] %v1586_v55   ;;  %v870_v2 = vmax.f32 %v670_v58, 0.0  ;;  %v902_v3 = vmax.f32 %v798_v59, 0.0 }
 0x16a   :  { %v672_v60 = vpop.f32.mrf.mxu0  ;;  %v800_v61 = vpop.f32.mrf.mxu1 }
 0x16b   :  { %v673_v62 = vadd.f32 %v1944_v17, %v672_v60  ;;  %v801_v63 = vadd.f32 %v1944_v17, %v800_v61 }
 0x16c   :  { %v674_v0 = vpop.f32.mrf.mxu0  ;;  %v802_v1 = vpop.f32.mrf.mxu1 }
 0x16d   :  { %v871_v4 = vmax.f32 %v673_v62, 0.0  ;;  %v903_v5 = vmax.f32 %v801_v63, 0.0 }
 0x16e   :  { %v677_v6 = vpop.f32.mrf.mxu0  ;;  %v805_v7 = vpop.f32.mrf.mxu1 }
 0x16f   :  { %v1511_v8 = vpack.c.bf16 %v871_v4, %v870_v2  ;;  %v1591_v9 = vpack.c.bf16 %v903_v5, %v902_v3  ;;  %v678_v12 = vadd.f32 %v1944_v17, %v677_v6  ;;  %v806_v13 = vadd.f32 %v1944_v17, %v805_v7 }
 0x170   :  { %v679_v10 = vpop.f32.mrf.mxu0  ;;  %v807_v11 = vpop.f32.mrf.mxu1 }
 0x171   :  { %1631 = vst [vmem:[#allocation7 + $0x48] sm:$0xff] %v1511_v8   ;;  %1647 = vst [vmem:[#allocation7 + $0xc8] sm:$0xff] %v1591_v9   ;;  %v872_v21 = vmax.f32 %v678_v12, 0.0  ;;  %v904_v22 = vmax.f32 %v806_v13, 0.0 }
 0x172   :  { %v680_v14 = vpop.f32.mrf.mxu0  ;;  %v808_v15 = vpop.f32.mrf.mxu1 }
 0x173   :  { %v681_v16 = vadd.f32 %v1944_v17, %v680_v14  ;;  %v809_v18 = vadd.f32 %v1944_v17, %v808_v15 }
 0x174   :  { %v682_v19 = vpop.f32.mrf.mxu0  ;;  %v810_v20 = vpop.f32.mrf.mxu1 }
 0x175   :  { %v873_v23 = vmax.f32 %v681_v16, 0.0  ;;  %v905_v24 = vmax.f32 %v809_v18, 0.0 }
 0x176   :  { %v685_v25 = vpop.f32.mrf.mxu0  ;;  %v813_v26 = vpop.f32.mrf.mxu1 }
 0x177   :  { %v1516_v27 = vpack.c.bf16 %v873_v23, %v872_v21  ;;  %v1596_v28 = vpack.c.bf16 %v905_v24, %v904_v22  ;;  %v686_v31 = vadd.f32 %v1944_v17, %v685_v25  ;;  %v814_v32 = vadd.f32 %v1944_v17, %v813_v26 }
 0x178   :  { %v687_v29 = vpop.f32.mrf.mxu0  ;;  %v815_v30 = vpop.f32.mrf.mxu1 }
 0x179   :  { %1632 = vst [vmem:[#allocation7 + $0x50] sm:$0xff] %v1516_v27   ;;  %1648 = vst [vmem:[#allocation7 + $0xd0] sm:$0xff] %v1596_v28   ;;  %v874_v39 = vmax.f32 %v686_v31, 0.0  ;;  %v906_v40 = vmax.f32 %v814_v32, 0.0 }
 0x17a   :  { %v688_v33 = vpop.f32.mrf.mxu0  ;;  %v816_v34 = vpop.f32.mrf.mxu1 }
 0x17b   :  { %v689_v35 = vadd.f32 %v1944_v17, %v688_v33  ;;  %v817_v36 = vadd.f32 %v1944_v17, %v816_v34 }
 0x17c   :  { %v690_v37 = vpop.f32.mrf.mxu0  ;;  %v818_v38 = vpop.f32.mrf.mxu1 }
 0x17d   :  { %v875_v41 = vmax.f32 %v689_v35, 0.0  ;;  %v907_v42 = vmax.f32 %v817_v36, 0.0 }
 0x17e   :  { %v693_v43 = vpop.f32.mrf.mxu0  ;;  %v821_v44 = vpop.f32.mrf.mxu1 }
 0x17f   :  { %v1521_v45 = vpack.c.bf16 %v875_v41, %v874_v39  ;;  %v1601_v46 = vpack.c.bf16 %v907_v42, %v906_v40  ;;  %v694_v49 = vadd.f32 %v1944_v17, %v693_v43  ;;  %v822_v50 = vadd.f32 %v1944_v17, %v821_v44 }
 0x180   :  { %v695_v47 = vpop.f32.mrf.mxu0  ;;  %v823_v48 = vpop.f32.mrf.mxu1 }
 0x181   :  { %1633 = vst [vmem:[#allocation7 + $0x58] sm:$0xff] %v1521_v45   ;;  %1649 = vst [vmem:[#allocation7 + $0xd8] sm:$0xff] %v1601_v46   ;;  %v876_v57 = vmax.f32 %v694_v49, 0.0  ;;  %v908_v58 = vmax.f32 %v822_v50, 0.0 }
 0x182   :  { %v696_v51 = vpop.f32.mrf.mxu0  ;;  %v824_v52 = vpop.f32.mrf.mxu1 }
 0x183   :  { %v697_v53 = vadd.f32 %v1944_v17, %v696_v51  ;;  %v825_v54 = vadd.f32 %v1944_v17, %v824_v52 }
 0x184   :  { %v698_v55 = vpop.f32.mrf.mxu0  ;;  %v826_v56 = vpop.f32.mrf.mxu1 }
 0x185   :  { %v877_v59 = vmax.f32 %v697_v53, 0.0  ;;  %v909_v60 = vmax.f32 %v825_v54, 0.0 }
 0x186   :  { %v701_v61 = vpop.f32.mrf.mxu0  ;;  %v829_v62 = vpop.f32.mrf.mxu1 }
 0x187   :  { %v1526_v63 = vpack.c.bf16 %v877_v59, %v876_v57  ;;  %v1606_v0 = vpack.c.bf16 %v909_v60, %v908_v58  ;;  %v702_v3 = vadd.f32 %v1944_v17, %v701_v61  ;;  %v830_v4 = vadd.f32 %v1944_v17, %v829_v62 }
 0x188   :  { %v703_v1 = vpop.f32.mrf.mxu0  ;;  %v831_v2 = vpop.f32.mrf.mxu1 }
 0x189   :  { %1634 = vst [vmem:[#allocation7 + $0x60] sm:$0xff] %v1526_v63   ;;  %1650 = vst [vmem:[#allocation7 + $0xe0] sm:$0xff] %v1606_v0   ;;  %v878_v11 = vmax.f32 %v702_v3, 0.0  ;;  %v910_v12 = vmax.f32 %v830_v4, 0.0 }
 0x18a   :  { %v704_v5 = vpop.f32.mrf.mxu0  ;;  %v832_v6 = vpop.f32.mrf.mxu1 }
 0x18b   :  { %v705_v7 = vadd.f32 %v1944_v17, %v704_v5  ;;  %v833_v8 = vadd.f32 %v1944_v17, %v832_v6 }
 0x18c   :  { %v706_v9 = vpop.f32.mrf.mxu0  ;;  %v834_v10 = vpop.f32.mrf.mxu1 }
 0x18d   :  { %v879_v13 = vmax.f32 %v705_v7, 0.0  ;;  %v911_v14 = vmax.f32 %v833_v8, 0.0 }
 0x18e   :  { %v709_v15 = vpop.f32.mrf.mxu0  ;;  %v837_v16 = vpop.f32.mrf.mxu1 }
 0x18f   :  { %v1531_v18 = vpack.c.bf16 %v879_v13, %v878_v11  ;;  %v1611_v19 = vpack.c.bf16 %v911_v14, %v910_v12  ;;  %v710_v22 = vadd.f32 %v1944_v17, %v709_v15  ;;  %v838_v23 = vadd.f32 %v1944_v17, %v837_v16 }
 0x190   :  { %v711_v20 = vpop.f32.mrf.mxu0  ;;  %v839_v21 = vpop.f32.mrf.mxu1 }
 0x191   :  { %1635 = vst [vmem:[#allocation7 + $0x68] sm:$0xff] %v1531_v18   ;;  %1651 = vst [vmem:[#allocation7 + $0xe8] sm:$0xff] %v1611_v19   ;;  %v880_v30 = vmax.f32 %v710_v22, 0.0  ;;  %v912_v31 = vmax.f32 %v838_v23, 0.0 }
 0x192   :  { %v712_v24 = vpop.f32.mrf.mxu0  ;;  %v840_v25 = vpop.f32.mrf.mxu1 }
 0x193   :  { %v713_v26 = vadd.f32 %v1944_v17, %v712_v24  ;;  %v841_v27 = vadd.f32 %v1944_v17, %v840_v25 }
 0x194   :  { %v714_v28 = vpop.f32.mrf.mxu0  ;;  %v842_v29 = vpop.f32.mrf.mxu1 }
 0x195   :  { %v881_v32 = vmax.f32 %v713_v26, 0.0  ;;  %v913_v33 = vmax.f32 %v841_v27, 0.0 }
 0x196   :  { %v717_v34 = vpop.f32.mrf.mxu0  ;;  %v845_v35 = vpop.f32.mrf.mxu1 }
 0x197   :  { %v1536_v36 = vpack.c.bf16 %v881_v32, %v880_v30  ;;  %v1616_v37 = vpack.c.bf16 %v913_v33, %v912_v31  ;;  %v718_v40 = vadd.f32 %v1944_v17, %v717_v34  ;;  %v846_v41 = vadd.f32 %v1944_v17, %v845_v35 }
 0x198   :  { %v719_v38 = vpop.f32.mrf.mxu0  ;;  %v847_v39 = vpop.f32.mrf.mxu1 }
 0x199   :  { %1636 = vst [vmem:[#allocation7 + $0x70] sm:$0xff] %v1536_v36   ;;  %1652 = vst [vmem:[#allocation7 + $0xf0] sm:$0xff] %v1616_v37   ;;  %v882_v48 = vmax.f32 %v718_v40, 0.0  ;;  %v914_v49 = vmax.f32 %v846_v41, 0.0 }
 0x19a   :  { %v720_v42 = vpop.f32.mrf.mxu0  ;;  %v848_v43 = vpop.f32.mrf.mxu1 }
 0x19b   :  { %v721_v44 = vadd.f32 %v1944_v17, %v720_v42  ;;  %v849_v45 = vadd.f32 %v1944_v17, %v848_v43 }
 0x19c   :  { %v722_v46 = vpop.f32.mrf.mxu0  ;;  %v850_v47 = vpop.f32.mrf.mxu1 }
 0x19d   :  { %v883_v50 = vmax.f32 %v721_v44, 0.0  ;;  %v915_v51 = vmax.f32 %v849_v45, 0.0 }
 0x19f   :  { %v1541_v52 = vpack.c.bf16 %v883_v50, %v882_v48  ;;  %v1621_v53 = vpack.c.bf16 %v915_v51, %v914_v49 }
 0x1a1   :  { %1637 = vst [vmem:[#allocation7 + $0x78] sm:$0xff] %v1541_v52   ;;  %1653 = vst [vmem:[#allocation7 + $0xf8] sm:$0xff] %v1621_v53  }
 0x1a2   :  { %1857 = shalt.err (!%p1854_p0)
}
 0x1a3   :  { %1247 = dma.vmem_to_hbm [thread:$0]  %s1242_s26, 4096, %s2019_s3, [#allocation4], %s1876_s22, %s1876_s22, %s1877_s23  }
 0x1a4   :  { %1870 = dma.done.wait [#allocation4], 4096  }
 0x1a5   :  { %1871 = vsyncadd [#allocation4], 4294963200 }
 0x1a6   :  { %1251 = vsyncpa [#allocation3], 1 }
 0x1a7   :  { %1252 = vsyncpa [#allocation6], 1 }
 0x1a8   :  { %1253 = vsyncpa [#allocation4], 1 }

</bundles_post_ra>
